<compile_context>
chip_gen: v7x
topology: tpu7x:2x2x1
jax: 0.10.0
libtpu: 0.0.40
codegen_flags: <defaults>
</compile_context>

<pallas_src>
import functools

import jax
import jax.numpy as jnp
from jax.experimental import pallas as pl
from jax.experimental.pallas import tpu as pltpu


def _round_up(x, m):
    return ((x + m - 1) // m) * m


def _patch_embed_kernel(x_ref, w_ref, b_ref, o_ref):
    # x_ref: (TM, d_in) compute dtype (streamed / double-buffered per grid step)
    # w_ref: (d_in, hidden) compute dtype (resident), b_ref: (1, hidden) f32 (resident)
    # o_ref: (TM, hidden) output dtype
    acc = jnp.dot(x_ref[...], w_ref[...], preferred_element_type=jnp.float32)
    # f32 epilogue (bias add) before the single cast at the store -- correct on
    # all generations, required for good codegen on v5e (no bf16 VPU path).
    o_ref[...] = (acc + b_ref[...]).astype(o_ref.dtype)


def unfold_patches(x, patch_size):
    """nn.Unfold(kernel=p, stride=p) + movedim(1,-1): (B,C,H,W) -> (B, L, C*p*p)."""
    B, C, H, W = x.shape
    p = patch_size
    hp, wp = H // p, W // p
    # (B, C, hp, p, wp, p) -> (B, hp, wp, C, p, p): patch vector is c-major, kh, kw,
    # matching nn.Unfold's channel-major column ordering.
    x = x.reshape(B, C, hp, p, wp, p)
    x = x.transpose(0, 2, 4, 1, 3, 5)
    return x.reshape(B, hp * wp, C * p * p)


@functools.partial(
    jax.jit, static_argnames=("patch_size", "compute_dtype", "tm", "out_dtype"))
def patch_embedding_forward(x, weight, bias, *, patch_size,
                            compute_dtype=jnp.bfloat16, tm=1024, out_dtype=None):
    """x: (B, C, H, W); weight: (hidden, d_in) [PyTorch Linear layout]; bias: (hidden,)."""
    B, C, H, W = x.shape
    hidden, d_in = weight.shape
    if out_dtype is None:
        out_dtype = x.dtype

    # Patch extraction (pure layout).  Under jit the cast + reshape + transpose
    # fuse into ONE XLA pass over the activations in the compute dtype.
    patches = unfold_patches(x.astype(compute_dtype), patch_size)   # (B, L, d_in)
    L = patches.shape[1]
    M = B * L

    # Tile the M = B*L axis.  Multiple of 16 (bf16 sublane packing); at least two
    # grid steps whenever M allows so the "parallel" axis can shard across both
    # v7x TensorCores; capped at `tm` for large M to amortize per-step overhead.
    tm_eff = min(tm, max(16, _round_up((M + 1) // 2, 16)))
    tm_eff = min(tm_eff, _round_up(M, 16))
    m_pad = _round_up(M, tm_eff)

    patches_2d = patches.reshape(M, d_in)
    if m_pad != M:
        # Row padding only (no K padding); padded tail rows are sliced away below.
        patches_2d = jnp.pad(patches_2d, ((0, m_pad - M), (0, 0)))
    w_t = weight.astype(compute_dtype).T                 # (d_in, hidden), small
    b_2d = bias.astype(jnp.float32).reshape(1, hidden)   # f32 epilogue operand

    grid = (m_pad // tm_eff,)

    c_bytes = jnp.dtype(compute_dtype).itemsize
    o_bytes = jnp.dtype(out_dtype).itemsize
    cost = pl.CostEstimate(
        flops=2 * M * d_in * hidden,
        transcendentals=0,
        bytes_accessed=(M * d_in * c_bytes        # activations in
                        + d_in * hidden * c_bytes  # weight in
                        + hidden * 4               # bias in
                        + M * hidden * o_bytes))   # output out

    out_2d = pl.pallas_call(
        _patch_embed_kernel,
        out_shape=jax.ShapeDtypeStruct((m_pad, hidden), out_dtype),
        grid_spec=pltpu.PrefetchScalarGridSpec(
            num_scalar_prefetch=0,
            grid=grid,
            in_specs=[
                # activation tile: streamed / double-buffered over the M axis;
                # last dim = d_in (full extent) -> no HBM K padding.
                pl.BlockSpec((tm_eff, d_in), lambda i: (i, 0)),
                # weight + bias: VMEM-resident across all grid steps.
                pl.BlockSpec((d_in, hidden), lambda i: (0, 0)),
                pl.BlockSpec((1, hidden), lambda i: (0, 0)),
            ],
            # last dim = hidden (full extent) -> no HBM N padding / strip pass.
            out_specs=pl.BlockSpec((tm_eff, hidden), lambda i: (i, 0)),
        ),
        compiler_params=pltpu.CompilerParams(
            # parallel M axis -> megacore sharding on v7x (near no-op on v5e/v6e)
            dimension_semantics=("parallel",),
            # Tiles here need only a few MiB; keep a conservative cap that is
            # valid on every generation (v7x physical VMEM is 64 MiB).
            vmem_limit_bytes=32 * 1024 * 1024,
        ),
        cost_estimate=cost,
    )(patches_2d, w_t, b_2d)

    # Strip M padding (no-op when m_pad == M) and restore (B, L, hidden).
    return out_2d[:M].reshape(B, L, hidden)


if __name__ == "__main__":
    # model_settings: patch_size=4, num_channels=4, num_hidden=32, input_shape=(16,16)
    patch_size = 4
    num_channels = 4
    num_hidden = 32
    H = W = 16
    B = 2
    d_in = num_channels * patch_size * patch_size        # 64
    num_patches = (H // patch_size) * (W // patch_size)  # 16

    key = jax.random.PRNGKey(0)
    kx, kw, kb = jax.random.split(key, 3)

    x = jax.random.normal(kx, (B, num_channels, H, W), dtype=jnp.float32)
    # Deterministic init mimicking nn.Linear default U(-1/sqrt(fan_in), 1/sqrt(fan_in))
    bound = 1.0 / (d_in ** 0.5)
    weight = jax.random.uniform(kw, (num_hidden, d_in), minval=-bound, maxval=bound,
                                dtype=jnp.float32)
    bias = jax.random.uniform(kb, (num_hidden,), minval=-bound, maxval=bound,
                              dtype=jnp.float32)

    out = patch_embedding_forward(x, weight, bias, patch_size=patch_size)
    out = jax.block_until_ready(out)
    assert out.shape == (B, num_patches, num_hidden), out.shape
    assert out.dtype == x.dtype

    # Reference: same unfold ordering + linear, with matching bf16 input rounding
    # (kernel does bf16 x bf16 -> f32 accumulate on the MXU, f32 bias add).
    pat = unfold_patches(x, patch_size).astype(jnp.bfloat16).astype(jnp.float32)
    w_r = weight.astype(jnp.bfloat16).astype(jnp.float32)
    ref = jnp.einsum("bld,hd->blh", pat, w_r,
                     precision=jax.lax.Precision.HIGHEST) + bias
    assert jnp.allclose(out, ref, atol=1e-4, rtol=1e-4), \
        float(jnp.max(jnp.abs(out - ref)))

    print("KERNEL_OK")
</pallas_src>

<mosaic_0001>
module attributes {stable_mosaic.version = 11 : i64} {
  func.func @_patch_embed_kernel(%arg0: i32, %arg1: memref<16x64xbf16, #tpu.memory_space<vmem>>, %arg2: memref<64x32xbf16, #tpu.memory_space<vmem>>, %arg3: memref<1x32xf32, #tpu.memory_space<vmem>>, %arg4: memref<16x32xf32, #tpu.memory_space<vmem>>) attributes {dimension_semantics = [#tpu.dimension_semantics<parallel>], iteration_bounds = array<i64: 2>, scalar_prefetch = 0 : i64, scratch_operands = 0 : i64, tpu.core_type = #tpu.core_type<tc>, window_params = [{transform_indices = @transform_0, window_bounds = array<i64: 16, 64>}, {pipeline_mode = #tpu.pipeline_mode<synchronous>, transform_indices = @transform_1, window_bounds = array<i64: 64, 32>}, {pipeline_mode = #tpu.pipeline_mode<synchronous>, transform_indices = @transform_2, window_bounds = array<i64: 1, 32>}, {transform_indices = @transform_3, window_bounds = array<i64: 16, 32>}]} {
    %c0 = arith.constant 0 : index
    %c0_0 = arith.constant 0 : index
    %0 = vector.load %arg1[%c0, %c0_0] : memref<16x64xbf16, #tpu.memory_space<vmem>>, vector<16x64xbf16>
    %c0_1 = arith.constant 0 : index
    %c0_2 = arith.constant 0 : index
    %1 = vector.load %arg2[%c0_1, %c0_2] : memref<64x32xbf16, #tpu.memory_space<vmem>>, vector<64x32xbf16>
    %cst = arith.constant dense<0.000000e+00> : vector<16x32xf32>
    %2 = tpu.matmul %0, %1, %cst {dimension_numbers = #tpu.dot_dimension_numbers<[1], [0], [0], [1], [0, 0, 1, 1], [], []>} : vector<16x64xbf16>, vector<64x32xbf16>, vector<16x32xf32> -> vector<16x32xf32>
    %c0_3 = arith.constant 0 : index
    %c0_4 = arith.constant 0 : index
    %3 = vector.load %arg3[%c0_3, %c0_4] : memref<1x32xf32, #tpu.memory_space<vmem>>, vector<1x32xf32>
    %4 = vector.broadcast %3 : vector<1x32xf32> to vector<16x32xf32>
    %5 = arith.addf %2, %4 : vector<16x32xf32>
    %c0_5 = arith.constant 0 : index
    %c0_6 = arith.constant 0 : index
    %6 = vector.load %arg4[%c0_5, %c0_6] : memref<16x32xf32, #tpu.memory_space<vmem>>, vector<16x32xf32>
    tpu.vector_store %arg4[%c0_5, %c0_6], %5 {strides = array<i32>} : memref<16x32xf32, #tpu.memory_space<vmem>>, vector<16x32xf32>,
    return
  }
  func.func @transform_0(%arg0: i32) -> (i32, i32) {
    %c0_i32 = arith.constant 0 : i32
    %c0_i32_0 = arith.constant 0 : i32
    return %arg0, %c0_i32 : i32, i32
  }
  func.func @transform_1(%arg0: i32) -> (i32, i32) {
    %c0_i32 = arith.constant 0 : i32
    %c0_i32_0 = arith.constant 0 : i32
    %c0_i32_1 = arith.constant 0 : i32
    return %c0_i32, %c0_i32_0 : i32, i32
  }
  func.func @transform_2(%arg0: i32) -> (i32, i32) {
    %c0_i32 = arith.constant 0 : i32
    %c0_i32_0 = arith.constant 0 : i32
    %c0_i32_1 = arith.constant 0 : i32
    return %c0_i32, %c0_i32_0 : i32, i32
  }
  func.func @transform_3(%arg0: i32) -> (i32, i32) {
    %c0_i32 = arith.constant 0 : i32
    %c0_i32_0 = arith.constant 0 : i32
    return %arg0, %c0_i32 : i32, i32
  }
}

</mosaic_0001>

<bundles_post_ra>
// kernel: patch_embedding_forward.1
= control target key start
LH: loop header
LB: loop body
LE: loop exit
PB: predicated region body
PF: predicated region fallthrough
CT: control target
= control target key end

     0   :  { %8 = vsyncpa [#allocation3], 0  ;;  %s634_s0 = inlined_call_operand.vmem [shape: bf16[32,64], index: 0, kind: input, shape index: {}]   ;;  %s635_s1 = inlined_call_operand.vmem [shape: bf16[64,32], index: 1, kind: input, shape index: {}]   ;;  %s636_s2 = inlined_call_operand.vmem [shape: f32[1,32], index: 2, kind: input, shape index: {}]   ;;  %s637_s3 = inlined_call_operand.hbm [shape: f32[32,32], index: 3, kind: output, shape index: {}]  }
   0x1   :  { %10 = vsyncpa [#allocation3 + $0x1], 0  ;;  %s517_s12 = smov 0   ;;  %s519_s13 = smov 0  }
   0x2   :  { %s521_s14 = smov 0   ;;  %s523_s15 = smov 0  }
   0x3 LB: > { %s538_s16 = sadd.s32 4294967295, %s490_s15   ;;  %s343_s17 = sadd.s32 4294967294, %s490_s15   ;;  %s490_s15 = sphi %s523_s15, %s643_s15   ;;  %s486_s14 = sphi %s521_s14, %s642_s14   ;;  %s482_s13 = sphi %s519_s13, %s641_s13   ;;  %s478_s12 = sphi %s517_s12, %s640_s12  }
   0x4   : > { %s542_s18 = sadd.s32 1, %s490_s15   ;;  %s91_s19 = sadd.s32 1, %s486_s14 }
   0x5   : > { %s88_s20 = ssub.s32 %s490_s15, %s542_s18  ;;  %p101_p0 = scmp.ne.s32.totalorder %s486_s14, %s482_s13 }
   0x6   : > { %p89_p1 = scmp.eq.s32.totalorder %s88_s20, 0  ;;  %p102_p2 = scmp.eq.s32.totalorder %s538_s16, 1 }
   0x7   : > { %p107_p3 = scmp.ne.s32.totalorder %s482_s13, %s478_s12  ;;  %p108_p4 = scmp.eq.s32.totalorder %s343_s17, 1 }
   0x8   : > { %s553_s21 = scalar_select %p89_p1, %s486_s14, %s91_s19  }
   0x9   : > { %p555_p5 = por %p102_p2, %p101_p0  ;;  %p559_p6 = por %p108_p4, %p107_p3 }
   0xa   : > { %p346_p7 = scmp.ge.s32.totalorder %s490_s15, 1  ;;  %p141_p8 = scmp.lt.s32.totalorder %s490_s15, 3 }
   0xc   : > { %p142_p9 = pnand %p346_p7, %p141_p8 }
   0xd   : > { %v423_v0 = vld [vmem:[%s635_s1] sm:$0xff] (!%p142_p9)   ;;  %v492_v1 = vmov (!%p142_p9), 0.0   ;;  %v424_v2 = vld [vmem:[%s635_s1 + $0x8] sm:$0xff] (!%p142_p9)   ;;  %vm493_vm0 = vmmov (!%p142_p9), 0   ;;  %s348_s28 = sshll.u32 (!%p142_p9), %s538_s16, 1  ;;  %v425_v3 = vld [vmem:[%s635_s1 + $0x10] sm:$0xff] (!%p142_p9)  }
   0xe   : > { %145 = sbr.rel (%p142_p9) target bundleno = 261 (0x105), region = 32  ;;  %368 = vmatprep.subr.bf16.mxu0 (!%p142_p9), %v492_v1  ;;  %376 = vmatprep.mubr.msk.bf16.mxu0 (!%p142_p9), %vm493_vm0, %v492_v1  ;;  %p166_p10 = scmp.lt.s32.totalorder (!%p142_p9), %s348_s28, 3  ;;  %v426_v4 = vld [vmem:[%s635_s1 + $0x18] sm:$0xff] (!%p142_p9)   ;;  %vm219_vm1 = vcmask (!%p142_p9), 523264   ;;  %v350_v6 = vld [vmem:[%s636_s2] ss:$0 sm:$0xff] (!%p142_p9) }
   0xf   : > { %369 = vmatpush3.bf16.msra.mxu0 (!%p142_p9), %v423_v0  ;;  %s162_s10 = sand.u32 (!%p142_p9), 1, %s482_s13   ;;  %s362_s25 = sshll.u32 (!%p142_p9), %s538_s16, 8  ;;  %vm264_vm2 = vcmask (!%p142_p9), 261120  }
  0x10   : > { %370 = vmatprep.subr.bf16.mxu0 (!%p142_p9), %v492_v1  ;;  %s347_s11 = sshll.u32 (!%p142_p9), %s162_s10, 4  ;;  %s593_s16 = scalar_lea.sflag (!%p142_p9), [#allocation3], %s162_s10 }
  0x11   : > { %s164_s20 = scalar_lea.vmem (!%p142_p9), [#allocation2], %s347_s11  ;;  %s494_s30 = smov (!%p142_p9), [#allocation2]  }
  0x12   : > { %s281_s24 = sshll.u32 (!%p142_p9), %s164_s20, 4  ;;  %s586_s24 = int_to_ptr.vmem [resolvable:$true] %s281_s24 }
  0x13   : > { %371 = vmatpush3.bf16.msra.mxu0 (!%p142_p9), %v424_v2  ;;  %s428_s29 = scalar_lea.vmem (!%p142_p9), %s586_s24, 256 }
  0x14   : > { %372 = vmatprep.subr.bf16.mxu0 (!%p142_p9), %v492_v1  ;;  %p429_p11 = scmp.ne.s32.totalorder (!%p142_p9), %s586_s24, %s428_s29 }
  0x15   : > { %s645_s28 = smov (!%p166_p10, %s348_s28), 3 }
  0x16   : > { %s349_s4 = sshll.u32 %s645_s28, 2  ;;  %s591_s28 = scalar_lea.hbm %s637_s3, %s362_s25 }
  0x17   : > { %s169_s7 = scalar_lea.vmem %s634_s0, %s349_s4  ;;  %373 = vmatpush3.bf16.msra.mxu0 %v425_v3  ;;  %p430_p12 = pnand %p429_p11, %p555_p5 }
  0x18   : > { %374 = vmatprep.subr.bf16.mxu0 %v492_v1  ;;  %v427_v5 = vld [vmem:[%s169_s7] sm:$0xff]   ;;  %s432_s4 = sshll.u32 %s494_s30, 4  ;;  %s433_s4 = int_to_ptr.vmem [resolvable:$false] %s432_s4 }
  0x19   : > { %p431_p13 = pneg %p430_p12  ;;  %s434_s5 = scalar_lea.vmem %s433_s4, 512 }
  0x1a   : > { %p435_p0 = scmp.lt.s32.totalorder %s586_s24, %s433_s4  ;;  %p436_p1 = scmp.lt.s32.totalorder %s434_s5, %s428_s29 }
  0x1b   : > { %375 = vmatpush3.bf16.msra.mxu0 %v426_v4 }
  0x1c   : > { %p437_p2 = por %p436_p1, %p435_p0 }
  0x1e   : > { %377 = vmatmul.mubr.msk.bf16.vlgmr.msra.gmra.mrb[0].mxu0 %vm219_vm1, %v427_v5  ;;  %p438_p3 = pnand %p437_p2, %p431_p13 }
  0xf1   : > { %v257_v7 = vpop.f32.mrb[0].mxu0 }
  0xf2   : > { %v258_v8 = vadd.f32 %v350_v6, %v257_v7  ;;  %v378_v9 = vpop.f32.mrb[1].mxu0 }
  0xf3   : > { %v260_v10 = vpop.f32.mrb[2].mxu0 }
  0xf4   : > { %265 = vst.msk [vmem:[%s164_s20] sm:$0xff] %vm264_vm2, %v258_v8  ;;  %v261_v11 = vadd.f32 %v350_v6, %v260_v10  ;;  %v379_v12 = vpop.f32.mrb[3].mxu0 }
  0xf6   : > { %266 = vst.msk [vmem:[%s164_s20 + $0x8] sm:$0xff] %vm264_vm2, %v261_v11 }
  0xf7   : > { %441 = shalt.err (!%p438_p3)
}
  0xf8   : > { %s442_s6 = scalar_lea.hbm %s591_s28, 256  ;;  %s446_s9 = scalar_lea.hbm %s637_s3, 512 }
  0xf9   : > { %p443_p4 = scmp.ne.s32.totalorder %s591_s28, %s442_s6  ;;  %p447_p9 = scmp.lt.u32.totalorder %s591_s28, %s637_s3 }
  0xfa   : > { %p448_p10 = scmp.lt.u32.totalorder %s446_s9, %s442_s6  ;;  %p450_p12 = scmp.lt.u32.totalorder %s442_s6, %s591_s28 }
  0xfb   : > { %p444_p7 = pnand %p443_p4, %p555_p5 }
  0xfc   : > { %p449_p11 = por %p448_p10, %p447_p9 }
  0xfd   : > { %p445_p8 = pneg %p444_p7 }
  0xfe   : > { %p451_p13 = por %p450_p12, %p449_p11 }
 0x100   : > { %p452_p0 = pnand %p451_p13, %p445_p8 }
 0x102   : > { %455 = shalt.err (!%p452_p0)
}
 0x103   : > { %s495_s17 = smov 128   ;;  %s496_s19 = smov 8  }
 0x104   : > { %380 = dma.vmem_to_hbm [thread:$0]  (%p555_p5), %s586_s24, 256, %s591_s28, %s593_s16, %s495_s17, %s495_s17, %s496_s19  }
 0x105 PF: > { %p386_p1 = scmp.ge.s32.totalorder %s490_s15, 2  ;;  %s296_s20 = sand.u32 1, %s478_s12  }
 0x106   : > { %s297_s25 = scalar_lea.sflag [#allocation3], %s296_s20 }
 0x107   : > { %p383_p2 = pnand %p386_p1, %p559_p6 }
 0x109   : > { %473 = dma.done.wait (!%p383_p2), %s297_s25, 256  }
 0x10a   : > { %475 = vsyncadd (!%p383_p2), %s297_s25, 4294967040  ;;  %p13_p3 = scmp.ge.s32.totalorder %s542_s18, 4   ;;  %s640_s12 = smov %s482_s13 }
 0x10b   : > { %s641_s13 = smov %s486_s14  ;;  %s642_s14 = smov %s553_s21 }
 0x10c   : > { %s643_s15 = smov %s542_s18  ;;  %15 = sbr.rel (!%p13_p3) target bundleno = 3 (0x3), region = 67 }
 0x113   :  { %302 = vsyncpa [#allocation3], 1 }
 0x114   :  { %304 = vsyncpa [#allocation3 + $0x1], 1 }

</bundles_post_ra>
